<compile_context>
chip_gen: v7x
topology: tpu7x:2x2x1
jax: 0.10.0
libtpu: 0.0.40
codegen_flags: <defaults>
</compile_context>

<pallas_src>
import math
import re
from functools import partial

import jax
import jax.numpy as jnp
import numpy as np
from jax.experimental import pallas as pl
from jax.experimental.pallas import tpu as pltpu

LOG2 = math.log(2.0)


def _shifted_softplus_kernel(x_ref, o_ref, *, compute_dtype):
    x = x_ref[...].astype(compute_dtype)
    # Numerically stable softplus: log(1 + exp(x)) = max(x, 0) + log1p(exp(-|x|))
    # (matches F.softplus, including large-x saturation, to dtype tolerance).
    sp = jnp.maximum(x, 0.0) + jnp.log1p(jnp.exp(-jnp.abs(x)))
    o_ref[...] = (sp - LOG2).astype(o_ref.dtype)


def _tpu_generation() -> int:
    """Best-effort TPU generation (5, 6, 7, ...); 0 if unknown."""
    try:
        kind = jax.devices()[0].device_kind.lower()
        m = re.search(r"v(\d+)", kind)
        return int(m.group(1)) if m else 0
    except Exception:
        return 0


def _shifted_softplus_bulk(x_flat_bulk: jax.Array, n_bulk: int, gen: int) -> jax.Array:
    """Run the Pallas kernel on a 128-aligned flat chunk; returns a flat array."""
    dtype = x_flat_bulk.dtype
    itemsize = np.dtype(dtype).itemsize

    # Widest lane count (multiple of 128) that still gives >= 8 rows so every
    # vreg's 8 sublanes are filled; fall back to 128 lanes for tiny inputs.
    lanes = 128
    for cand in (2048, 1024, 512, 256):
        if n_bulk % cand == 0 and (n_bulk // cand) >= 8:
            lanes = cand
            break
    rows = n_bulk // lanes
    x2d = x_flat_bulk.reshape(rows, lanes)

    # Byte-based, generation-aware block size.
    #   v6e/v7x: 4 MiB blocks -> 4 x 4 MiB = 16 MiB resident (<= 32 MiB scoped).
    #   v5e/unknown: 2 MiB blocks -> 8 MiB resident (<= 16 MiB scoped default).
    block_bytes = (4 << 20) if gen >= 6 else (2 << 20)
    target_elems = max(lanes, block_bytes // itemsize)
    tile_rows = min(rows, max(8, target_elems // lanes))  # multiple of 8, or == rows

    # Guarantee >= 2 grid steps for mid/large inputs so both v7x TensorCores
    # get work (harmless extra step on single-TC v5e/v6e).
    if rows >= 16:
        half = ((pl.cdiv(rows, 2) + 7) // 8) * 8  # cdiv(rows,2) rounded up to x8
        tile_rows = min(tile_rows, half)

    grid = (pl.cdiv(rows, tile_rows),)

    # bf16 transcendentals only where the EUP supports bf16 (v6e/v7x) and the
    # caller's dtype is already bf16; otherwise compute in f32.
    if gen >= 6 and np.dtype(dtype) == np.dtype(jnp.bfloat16):
        compute_dtype = jnp.bfloat16
    else:
        compute_dtype = jnp.float32

    cost = pl.CostEstimate(
        flops=5 * n_bulk,
        transcendentals=2 * n_bulk,          # exp + log1p per element
        bytes_accessed=2 * n_bulk * itemsize,
    )

    out2d = pl.pallas_call(
        partial(_shifted_softplus_kernel, compute_dtype=compute_dtype),
        out_shape=jax.ShapeDtypeStruct((rows, lanes), dtype),
        grid_spec=pltpu.PrefetchScalarGridSpec(
            num_scalar_prefetch=0,
            grid=grid,
            in_specs=[pl.BlockSpec((tile_rows, lanes), lambda i: (i, 0))],
            out_specs=pl.BlockSpec((tile_rows, lanes), lambda i: (i, 0)),
        ),
        compiler_params=pltpu.CompilerParams(
            dimension_semantics=("parallel",),
        ),
        cost_estimate=cost,
    )(x2d)

    return out2d.reshape(-1)


def shifted_softplus(x: jax.Array) -> jax.Array:
    """Apply shifted softplus (softplus(x) - ln 2) elementwise, any shape."""
    orig_shape = x.shape
    dtype = x.dtype
    n = x.size
    if n == 0:
        return x

    x_flat = jnp.ravel(x)
    rem = n % 128
    n_bulk = n - rem

    if n_bulk == 0:
        # Tiny (<128 elems) input: a kernel launch isn't worth it.
        return (jax.nn.softplus(x.astype(jnp.float32)) - LOG2).astype(dtype).reshape(orig_shape)

    gen = _tpu_generation()
    out_bulk = _shifted_softplus_bulk(x_flat[:n_bulk] if rem else x_flat, n_bulk, gen)

    if rem:
        # <128-element tail: compute directly (avoids whole-array pad + slice copies).
        tail = x_flat[n_bulk:]
        tail_out = (jax.nn.softplus(tail.astype(jnp.float32)) - LOG2).astype(dtype)
        out_flat = jnp.concatenate([out_bulk, tail_out])
    else:
        out_flat = out_bulk

    return out_flat.reshape(orig_shape)


if __name__ == "__main__":
    key = jax.random.PRNGKey(0)

    # layout: NCHW, small shapes (batch=2, channels=4, spatial=16x16)
    x = jax.random.normal(key, (2, 4, 16, 16), dtype=jnp.float32) * 3.0
    y = jax.block_until_ready(shifted_softplus(x))
    y_ref = jax.nn.softplus(x) - LOG2
    assert y.shape == x.shape and y.dtype == x.dtype
    assert jnp.allclose(y, y_ref, atol=1e-6, rtol=1e-6), "mismatch vs reference (f32)"

    # Ragged (non-multiple-of-128) size exercises the bulk + tail path.
    x2 = jax.random.normal(jax.random.PRNGKey(0), (7, 19), dtype=jnp.float32) * 3.0
    y2 = jax.block_until_ready(shifted_softplus(x2))
    y2_ref = jax.nn.softplus(x2) - LOG2
    assert y2.shape == x2.shape and y2.dtype == x2.dtype
    assert jnp.allclose(y2, y2_ref, atol=1e-6, rtol=1e-6), "mismatch vs reference (ragged)"

    # bf16 I/O (bf16 EUP path on v6e/v7x, f32 compute on v5e/unknown).
    x3 = (jax.random.normal(jax.random.PRNGKey(0), (8, 256)) * 3.0).astype(jnp.bfloat16)
    y3 = jax.block_until_ready(shifted_softplus(x3))
    y3_ref = (jax.nn.softplus(x3.astype(jnp.float32)) - LOG2).astype(jnp.bfloat16)
    assert y3.shape == x3.shape and y3.dtype == jnp.bfloat16
    assert jnp.allclose(
        y3.astype(jnp.float32), y3_ref.astype(jnp.float32), atol=0.2, rtol=0.05
    ), "mismatch vs reference (bf16)"

    print("KERNEL_OK")
</pallas_src>

<mosaic_0001>
module attributes {stable_mosaic.version = 11 : i64} {
  func.func @_shifted_softplus_kernel(%arg0: i32, %arg1: memref<8x256xf32, #tpu.memory_space<vmem>>, %arg2: memref<8x256xf32, #tpu.memory_space<vmem>>) attributes {dimension_semantics = [#tpu.dimension_semantics<parallel>], iteration_bounds = array<i64: 1>, scalar_prefetch = 0 : i64, scratch_operands = 0 : i64, tpu.core_type = #tpu.core_type<tc>, window_params = [{transform_indices = @transform_0, window_bounds = array<i64: 8, 256>}, {transform_indices = @transform_1, window_bounds = array<i64: 8, 256>}]} {
    %c0 = arith.constant 0 : index
    %c0_0 = arith.constant 0 : index
    %0 = vector.load %arg1[%c0, %c0_0] : memref<8x256xf32, #tpu.memory_space<vmem>>, vector<8x256xf32>
    %cst = arith.constant 0.000000e+00 : f32
    %1 = vector.broadcast %cst : f32 to vector<8x256xf32>
    %2 = arith.maximumf %0, %1 : vector<8x256xf32>
    %3 = math.absf %0 : vector<8x256xf32>
    %cst_1 = arith.constant 0.000000e+00 : f32
    %4 = vector.broadcast %cst_1 : f32 to vector<8x256xf32>
    %5 = arith.subf %4, %3 : vector<8x256xf32>
    %6 = math.exp %5 : vector<8x256xf32>
    %7 = math.log1p %6 : vector<8x256xf32>
    %8 = arith.addf %2, %7 : vector<8x256xf32>
    %cst_2 = arith.constant 0.693147182 : f32
    %9 = vector.broadcast %cst_2 : f32 to vector<8x256xf32>
    %10 = arith.subf %8, %9 : vector<8x256xf32>
    %c0_3 = arith.constant 0 : index
    %c0_4 = arith.constant 0 : index
    %11 = vector.load %arg2[%c0_3, %c0_4] : memref<8x256xf32, #tpu.memory_space<vmem>>, vector<8x256xf32>
    tpu.vector_store %arg2[%c0_3, %c0_4], %10 {strides = array<i32>} : memref<8x256xf32, #tpu.memory_space<vmem>>, vector<8x256xf32>,
    return
  }
  func.func @transform_0(%arg0: i32) -> (i32, i32) {
    %c0_i32 = arith.constant 0 : i32
    %c0_i32_0 = arith.constant 0 : i32
    return %arg0, %c0_i32 : i32, i32
  }
  func.func @transform_1(%arg0: i32) -> (i32, i32) {
    %c0_i32 = arith.constant 0 : i32
    %c0_i32_0 = arith.constant 0 : i32
    return %arg0, %c0_i32 : i32, i32
  }
}

</mosaic_0001>

<bundles_post_ra>
// kernel: tpu_custom_call.1
= control target key start
LH: loop header
LB: loop body
LE: loop exit
PB: predicated region body
PF: predicated region fallthrough
CT: control target
= control target key end

     0   :  { %6 = vsyncpa [#allocation3], 0  ;;  %s168_s0 = inlined_call_operand.hbm [shape: f32[8,256], index: 0, kind: input, shape index: {}]   ;;  %s169_s1 = inlined_call_operand.hbm [shape: f32[8,256], index: 1, kind: output, shape index: {}]  }
   0x1   :  { %7 = vsyncpa [#allocation4], 0  ;;  %s132_s6 = smov [#allocation2]   ;;  %s84_s10 = scalar_lea.hbm %s168_s0, 256 }
   0x2   :  { %s14_s7 = sshll.u32 %s132_s6, 4  ;;  %p85_p0 = scmp.ne.s32.totalorder %s168_s0, %s84_s10  ;;  %s15_s7 = int_to_ptr.vmem [resolvable:$true] %s14_s7 }
   0x3   :  { %p88_p1 = scmp.lt.u32.totalorder %s84_s10, %s168_s0 }
   0x5   :  { %p90_p2 = pnand %p88_p1, %p85_p0 }
   0x7   :  { %93 = shalt.err (!%p90_p2)
}
   0x8   :  { %s94_s15 = scalar_lea.vmem %s15_s7, 256  ;;  %p99_p4 = scmp.lt.s32.totalorder %s15_s7, %s15_s7 }
   0x9   :  { %p95_p3 = scmp.ne.s32.totalorder %s15_s7, %s94_s15  ;;  %p100_p5 = scmp.lt.s32.totalorder %s94_s15, %s94_s15 }
   0xb   :  { %p101_p6 = por %p100_p5, %p99_p4 }
   0xd   :  { %p102_p7 = pnand %p101_p6, %p95_p3 }
   0xf   :  { %105 = shalt.err (!%p102_p7)
}
  0x10   :  { %17 = dma.hbm_to_vmem [thread:$0]  %s168_s0, 256, %s15_s7, [#allocation3]  }
  0x11   :  { %128 = dma.done.wait [#allocation3], 256  }
  0x12   :  { %129 = vsyncadd [#allocation3], 4294967040  ;;  %v21_v0 = vld [vmem:[#allocation2] sm:$0xff]  ;;  %v22_v1 = vld [vmem:[#allocation2 + $0x8] sm:$0xff]  ;;  %s133_s0 = smov [#allocation5]  }
  0x13   :  { %v25_v2 = vand.u32 2147483647, %v21_v0  ;;  %v26_v3 = vand.u32 2147483647, %v22_v1  ;;  %v23_v20 = vmax.f32 %v21_v0, 0.0  ;;  %v24_v24 = vmax.f32 %v22_v1, 0.0 }
  0x14   :  { %s63_s18 = sshll.u32 %s133_s0, 4  ;;  %s64_s18 = int_to_ptr.vmem [resolvable:$true] %s63_s18 }
  0x15   :  { %v27_v4 = vsub.f32 0.0, %v25_v2  ;;  %v28_v5 = vsub.f32 0.0, %v26_v3  ;;  %s106_s19 = scalar_lea.vmem %s64_s18, 256  ;;  %p111_p9 = scmp.lt.s32.totalorder %s64_s18, %s64_s18 }
  0x16   :  { %p107_p8 = scmp.ne.s32.totalorder %s64_s18, %s106_s19  ;;  %p112_p10 = scmp.lt.s32.totalorder %s106_s19, %s106_s19 }
  0x17   :  { %v29_v6 = vmul.f32 1.442695, %v27_v4  ;;  %v31_v7 = vmul.f32 1.442695, %v28_v5 }
  0x18   :  { %p113_p11 = por %p112_p10, %p111_p9 }
  0x19   :  { %76 = vpow2.f32 %v29_v6 }
  0x1a   :  { %78 = vpow2.f32 %v31_v7  ;;  %p114_p12 = pnand %p113_p11, %p107_p8 }
  0x23   :  { %v77_v8 = vpop.eup %76 }
  0x24   :  { %v79_v9 = vpop.eup %78  ;;  %v33_v10 = vadd.f32 1.0, %v77_v8  ;;  %v36_v12 = vmul.f32 -0.5, %v77_v8  ;;  %v39_v15 = vand.u32 2147483647, %v77_v8 }
  0x25   :  { %v42_v11 = vadd.f32 1.0, %v79_v9  ;;  %v45_v13 = vmul.f32 -0.5, %v79_v9  ;;  %v48_v17 = vand.u32 2147483647, %v79_v9 }
  0x26   :  { %80 = vlog2.f32 %v33_v10  ;;  %v37_v14 = vadd.f32 1.0, %v36_v12  ;;  %vm40_vm0 = vcmp.lt.f32.partialorder %v39_v15, 0.0004427343 }
  0x27   :  { %82 = vlog2.f32 %v42_v11  ;;  %v46_v16 = vadd.f32 1.0, %v45_v13  ;;  %vm49_vm1 = vcmp.lt.f32.partialorder %v48_v17, 0.0004427343 }
  0x28   :  { %v38_v18 = vmul.f32 %v77_v8, %v37_v14 }
  0x29   :  { %v47_v21 = vmul.f32 %v79_v9, %v46_v16 }
  0x30   :  { %v81_v19 = vpop.eup %80 }
  0x31   :  { %v83_v22 = vpop.eup %82  ;;  %v35_v23 = vmul.f32 0.6931472, %v81_v19 }
  0x32   :  { %v44_v25 = vmul.f32 0.6931472, %v83_v22 }
  0x33   :  { %v41_v26 = vsel %vm40_vm0, %v38_v18, %v35_v23 }
  0x34   :  { %v51_v27 = vadd.f32 %v41_v26, %v23_v20  ;;  %v50_v28 = vsel %vm49_vm1, %v47_v21, %v44_v25 }
  0x35   :  { %v52_v29 = vadd.f32 %v50_v28, %v24_v24 }
  0x36   :  { %v72_v30 = vadd.f32 -0.6931472, %v51_v27 }
  0x37   :  { %v73_v31 = vadd.f32 -0.6931472, %v52_v29 }
  0x38   :  { %55 = vst [vmem:[#allocation5] sm:$0xff] %v72_v30 }
  0x39   :  { %56 = vst [vmem:[#allocation5 + $0x8] sm:$0xff] %v73_v31 }
  0x3a   :  { %117 = shalt.err (!%p114_p12)
}
  0x3b   :  { %s118_s22 = scalar_lea.hbm %s169_s1, 256 }
  0x3c   :  { %p119_p13 = scmp.ne.s32.totalorder %s169_s1, %s118_s22  ;;  %p122_p0 = scmp.lt.u32.totalorder %s118_s22, %s169_s1 }
  0x3e   :  { %p124_p1 = pnand %p122_p0, %p119_p13 }
  0x40   :  { %127 = shalt.err (!%p124_p1)
}
  0x41   :  { %66 = dma.vmem_to_hbm [thread:$0]  %s64_s18, 256, %s169_s1, [#allocation4]  }
  0x42   :  { %130 = dma.done.wait [#allocation4], 256  }
  0x43   :  { %131 = vsyncadd [#allocation4], 4294967040 }
  0x44   :  { %70 = vsyncpa [#allocation3], 1 }
  0x45   :  { %71 = vsyncpa [#allocation4], 1 }

</bundles_post_ra>
